<compile_context>
chip_gen: v5e
topology: v5e:2x2
jax: 0.10.0
libtpu: 0.0.40
codegen_flags: <defaults>
</compile_context>

<pallas_src>
import jax
import jax.numpy as jnp
from jax.experimental import pallas as pl
from jax.experimental.pallas import tpu as pltpu

# MLP sizes from the torch module
ENC_BASE = 2
ENC_ENT = 2
ENC_MAX_ENTITIES = 171
NUM_IN = (ENC_BASE + ENC_ENT) * ENC_MAX_ENTITIES  # 684
H1 = 120
H2 = 60
OUT_SIZE = 6      # default out_size, no softmax / sigmoid
OUT_PAD = 8       # pad output columns (zeros) for a denser store; sliced off in wrapper

TB_MAX = 2048     # max batch-tile rows (double-buffered f32 x ~= 11 MiB, fits 32 MiB scoped VMEM)
VMEM_LIMIT_BYTES = 32 * 1024 * 1024


def _round_up(n, m):
    return ((n + m - 1) // m) * m


def _choose_tile(batch, tb_max=TB_MAX, num_cores=2):
    """Pick a batch tile <= tb_max whose tile count is balanced across 2 TCs (v7x).

    Harmless on single-TC v5e/v6e. Rows per tile are rounded up to 8 (sublane)."""
    n_pairs = -(-batch // (num_cores * tb_max))      # ceil
    n_tiles = num_cores * n_pairs
    tb = -(-batch // n_tiles)                         # ceil
    return max(8, _round_up(tb, 8))


def mlp_kernel(x_ref, w1_ref, b1_ref, w2_ref, b2_ref, w3_ref, b3_ref, o_ref):
    """One batch tile: (x @ W1 + b1) -> ReLU -> (@ W2 + b2) -> ReLU -> (@ W3 + b3)."""
    # In-kernel cast (torch's `state.float()`); bf16 on the MXU for the dominant
    # first dot, f32 accumulation + f32 bias/ReLU (v5e VPU has no bf16).
    x = x_ref[...].astype(jnp.bfloat16)                       # (TB, 684)
    h1 = jnp.dot(x, w1_ref[...], preferred_element_type=jnp.float32) + b1_ref[...]
    h1 = jnp.maximum(h1, 0.0)                                 # (TB, 120) f32

    h2 = jnp.dot(h1, w2_ref[...], preferred_element_type=jnp.float32) + b2_ref[...]
    h2 = jnp.maximum(h2, 0.0)                                 # (TB, 60) f32

    o_ref[...] = (jnp.dot(h2, w3_ref[...], preferred_element_type=jnp.float32)
                  + b3_ref[...])                              # (TB, 8) f32


def prepare_params(w1, b1, w2, b2, w3, b3):
    """One-time parameter prep (hoisted out of the per-call jitted path).

    W1 -> bf16 (feeds the bf16 first matmul); W3/b3 zero-padded to OUT_PAD cols."""
    w1b = w1.astype(jnp.bfloat16)
    pad = OUT_PAD - w3.shape[1]
    w3p = jnp.pad(w3, ((0, 0), (0, pad)))
    b3p = jnp.pad(b3, ((0, 0), (0, pad)))
    return w1b, b1, w2, b2, w3p, b3p


@jax.jit
def mlp_forward(state, w1b, b1, w2, b2, w3p, b3p):
    # Replicates `state.float().view(-1, num_in_features)` — the reshape is free,
    # the float() cast happens in-kernel so x is read from HBM in its source dtype.
    x = state.reshape(-1, NUM_IN)
    batch = x.shape[0]

    tb = _choose_tile(batch)
    grid = (pl.cdiv(batch, tb),)   # ragged final block handled by Pallas (masked writeback)

    x_bytes = batch * NUM_IN * jnp.dtype(x.dtype).itemsize
    w_bytes = (w1b.size * 2 + b1.size * 4 + w2.size * 4 + b2.size * 4
               + w3p.size * 4 + b3p.size * 4)
    out_bytes = batch * OUT_PAD * 4
    cost = pl.CostEstimate(
        flops=2 * batch * (NUM_IN * H1 + H1 * H2 + H2 * OUT_PAD),
        transcendentals=0,
        bytes_accessed=int(x_bytes + w_bytes + out_bytes),
    )

    out = pl.pallas_call(
        mlp_kernel,
        out_shape=jax.ShapeDtypeStruct((batch, OUT_PAD), jnp.float32),
        grid=grid,
        in_specs=[
            # x: tiled along batch, double-buffered by the Pallas pipeline.
            pl.BlockSpec((tb, NUM_IN), lambda i: (i, 0)),
            # Weights / biases: full blocks, constant index_map -> resident in VMEM.
            pl.BlockSpec((NUM_IN, H1), lambda i: (0, 0)),
            pl.BlockSpec((1, H1), lambda i: (0, 0)),
            pl.BlockSpec((H1, H2), lambda i: (0, 0)),
            pl.BlockSpec((1, H2), lambda i: (0, 0)),
            pl.BlockSpec((H2, OUT_PAD), lambda i: (0, 0)),
            pl.BlockSpec((1, OUT_PAD), lambda i: (0, 0)),
        ],
        out_specs=pl.BlockSpec((tb, OUT_PAD), lambda i: (i, 0)),
        compiler_params=pltpu.CompilerParams(
            dimension_semantics=("parallel",),
            vmem_limit_bytes=VMEM_LIMIT_BYTES,
        ),
        cost_estimate=cost,
    )(x, w1b, b1, w2, b2, w3p, b3p)

    return out[:, :OUT_SIZE]


def init_params(key):
    """Deterministic PyTorch-style Linear init: U(-1/sqrt(fan_in), 1/sqrt(fan_in)).

    Weights are produced already-transposed as (in, out); biases as (1, out)."""
    def linear(k, fan_in, fan_out):
        kw, kb = jax.random.split(k)
        bound = 1.0 / jnp.sqrt(jnp.float32(fan_in))
        w = jax.random.uniform(kw, (fan_in, fan_out), jnp.float32, -bound, bound)
        b = jax.random.uniform(kb, (1, fan_out), jnp.float32, -bound, bound)
        return w, b

    k1, k2, k3 = jax.random.split(key, 3)
    w1, b1 = linear(k1, NUM_IN, H1)
    w2, b2 = linear(k2, H1, H2)
    w3, b3 = linear(k3, H2, OUT_SIZE)
    return w1, b1, w2, b2, w3, b3


def _reference_matched(state, params):
    """Pure-JAX reference with the same bf16-first-layer numerics as the kernel."""
    w1, b1, w2, b2, w3, b3 = params
    xf = state.reshape(-1, NUM_IN).astype(jnp.bfloat16)
    h1 = jnp.maximum(
        jnp.dot(xf, w1.astype(jnp.bfloat16), preferred_element_type=jnp.float32) + b1,
        0.0)
    h2 = jnp.maximum(jnp.dot(h1, w2, preferred_element_type=jnp.float32) + b2, 0.0)
    return jnp.dot(h2, w3, preferred_element_type=jnp.float32) + b3


def _reference_f32(state, params):
    """Full-f32 reference (the exact torch semantics)."""
    w1, b1, w2, b2, w3, b3 = params
    xf = state.astype(jnp.float32).reshape(-1, NUM_IN)
    h1 = jnp.maximum(xf @ w1 + b1, 0.0)
    h2 = jnp.maximum(h1 @ w2 + b2, 0.0)
    return h2 @ w3 + b3


if __name__ == "__main__":
    key = jax.random.PRNGKey(0)
    k_params, k_x1, k_x2 = jax.random.split(key, 3)

    raw_params = init_params(k_params)
    params = jax.block_until_ready(prepare_params(*raw_params))  # one-time prep, outside the call path

    # Small example "state": batch=2, shaped (2, 171, 4); flattens to (2, 684).
    state = jax.random.normal(k_x1, (2, ENC_MAX_ENTITIES, ENC_BASE + ENC_ENT),
                              dtype=jnp.float32)
    y = jax.block_until_ready(mlp_forward(state, *params))
    assert y.shape == (2, OUT_SIZE)
    assert jnp.allclose(y, _reference_matched(state, raw_params), atol=2e-3, rtol=2e-3)
    assert jnp.allclose(y, _reference_f32(state, raw_params), atol=5e-2, rtol=5e-2)

    # Larger batch exercising multiple grid steps + the ragged final block
    # (2500 rows -> tb=1256, grid=(2,), second block is partial; no wrapper padding).
    state_big = jax.random.normal(k_x2, (2500, ENC_MAX_ENTITIES, ENC_BASE + ENC_ENT),
                                  dtype=jnp.float32)
    y_big = jax.block_until_ready(mlp_forward(state_big, *params))
    assert y_big.shape == (2500, OUT_SIZE)
    assert jnp.allclose(y_big, _reference_matched(state_big, raw_params), atol=2e-3, rtol=2e-3)
    assert jnp.allclose(y_big, _reference_f32(state_big, raw_params), atol=5e-2, rtol=5e-2)

    print("KERNEL_OK")
</pallas_src>

<mosaic_0001>
module attributes {stable_mosaic.version = 11 : i64} {
  func.func @mlp_kernel(%arg0: i32, %arg1: memref<8x684xf32, #tpu.memory_space<vmem>>, %arg2: memref<684x120xbf16, #tpu.memory_space<vmem>>, %arg3: memref<1x120xf32, #tpu.memory_space<vmem>>, %arg4: memref<120x60xf32, #tpu.memory_space<vmem>>, %arg5: memref<1x60xf32, #tpu.memory_space<vmem>>, %arg6: memref<60x8xf32, #tpu.memory_space<vmem>>, %arg7: memref<1x8xf32, #tpu.memory_space<vmem>>, %arg8: memref<8x8xf32, #tpu.memory_space<vmem>>) attributes {dimension_semantics = [#tpu.dimension_semantics<parallel>], iteration_bounds = array<i64: 1>, scalar_prefetch = 0 : i64, scratch_operands = 0 : i64, tpu.core_type = #tpu.core_type<tc>, window_params = [{transform_indices = @transform_0, window_bounds = array<i64: 8, 684>}, {pipeline_mode = #tpu.pipeline_mode<synchronous>, transform_indices = @transform_1, window_bounds = array<i64: 684, 120>}, {pipeline_mode = #tpu.pipeline_mode<synchronous>, transform_indices = @transform_2, window_bounds = array<i64: 1, 120>}, {pipeline_mode = #tpu.pipeline_mode<synchronous>, transform_indices = @transform_3, window_bounds = array<i64: 120, 60>}, {pipeline_mode = #tpu.pipeline_mode<synchronous>, transform_indices = @transform_4, window_bounds = array<i64: 1, 60>}, {pipeline_mode = #tpu.pipeline_mode<synchronous>, transform_indices = @transform_5, window_bounds = array<i64: 60, 8>}, {pipeline_mode = #tpu.pipeline_mode<synchronous>, transform_indices = @transform_6, window_bounds = array<i64: 1, 8>}, {transform_indices = @transform_7, window_bounds = array<i64: 8, 8>}]} {
    %c0 = arith.constant 0 : index
    %c0_0 = arith.constant 0 : index
    %0 = vector.load %arg1[%c0, %c0_0] : memref<8x684xf32, #tpu.memory_space<vmem>>, vector<8x684xf32>
    %1 = arith.truncf %0 : vector<8x684xf32> to vector<8x684xbf16>
    %c0_1 = arith.constant 0 : index
    %c0_2 = arith.constant 0 : index
    %2 = vector.load %arg2[%c0_1, %c0_2] : memref<684x120xbf16, #tpu.memory_space<vmem>>, vector<684x120xbf16>
    %cst = arith.constant dense<0.000000e+00> : vector<8x120xf32>
    %3 = tpu.matmul %1, %2, %cst {dimension_numbers = #tpu.dot_dimension_numbers<[1], [0], [0], [1], [0, 0, 1, 1], [], []>} : vector<8x684xbf16>, vector<684x120xbf16>, vector<8x120xf32> -> vector<8x120xf32>
    %c0_3 = arith.constant 0 : index
    %c0_4 = arith.constant 0 : index
    %4 = vector.load %arg3[%c0_3, %c0_4] : memref<1x120xf32, #tpu.memory_space<vmem>>, vector<1x120xf32>
    %5 = vector.broadcast %4 : vector<1x120xf32> to vector<8x120xf32>
    %6 = arith.addf %3, %5 : vector<8x120xf32>
    %cst_5 = arith.constant 0.000000e+00 : f32
    %7 = vector.broadcast %cst_5 : f32 to vector<8x120xf32>
    %8 = arith.maximumf %6, %7 : vector<8x120xf32>
    %c0_6 = arith.constant 0 : index
    %c0_7 = arith.constant 0 : index
    %9 = vector.load %arg4[%c0_6, %c0_7] : memref<120x60xf32, #tpu.memory_space<vmem>>, vector<120x60xf32>
    %cst_8 = arith.constant dense<0.000000e+00> : vector<8x60xf32>
    %10 = tpu.matmul %8, %9, %cst_8 {dimension_numbers = #tpu.dot_dimension_numbers<[1], [0], [0], [1], [0, 0, 1, 1], [], []>} : vector<8x120xf32>, vector<120x60xf32>, vector<8x60xf32> -> vector<8x60xf32>
    %c0_9 = arith.constant 0 : index
    %c0_10 = arith.constant 0 : index
    %11 = vector.load %arg5[%c0_9, %c0_10] : memref<1x60xf32, #tpu.memory_space<vmem>>, vector<1x60xf32>
    %12 = vector.broadcast %11 : vector<1x60xf32> to vector<8x60xf32>
    %13 = arith.addf %10, %12 : vector<8x60xf32>
    %cst_11 = arith.constant 0.000000e+00 : f32
    %14 = vector.broadcast %cst_11 : f32 to vector<8x60xf32>
    %15 = arith.maximumf %13, %14 : vector<8x60xf32>
    %c0_12 = arith.constant 0 : index
    %c0_13 = arith.constant 0 : index
    %16 = vector.load %arg6[%c0_12, %c0_13] : memref<60x8xf32, #tpu.memory_space<vmem>>, vector<60x8xf32>
    %cst_14 = arith.constant dense<0.000000e+00> : vector<8x8xf32>
    %17 = tpu.matmul %15, %16, %cst_14 {dimension_numbers = #tpu.dot_dimension_numbers<[1], [0], [0], [1], [0, 0, 1, 1], [], []>} : vector<8x60xf32>, vector<60x8xf32>, vector<8x8xf32> -> vector<8x8xf32>
    %c0_15 = arith.constant 0 : index
    %c0_16 = arith.constant 0 : index
    %18 = vector.load %arg7[%c0_15, %c0_16] : memref<1x8xf32, #tpu.memory_space<vmem>>, vector<1x8xf32>
    %19 = vector.broadcast %18 : vector<1x8xf32> to vector<8x8xf32>
    %20 = arith.addf %17, %19 : vector<8x8xf32>
    %c0_17 = arith.constant 0 : index
    %c0_18 = arith.constant 0 : index
    %21 = vector.load %arg8[%c0_17, %c0_18] : memref<8x8xf32, #tpu.memory_space<vmem>>, vector<8x8xf32>
    tpu.vector_store %arg8[%c0_17, %c0_18], %20 {strides = array<i32>} : memref<8x8xf32, #tpu.memory_space<vmem>>, vector<8x8xf32>,
    return
  }
  func.func @transform_0(%arg0: i32) -> (i32, i32) {
    %c0_i32 = arith.constant 0 : i32
    %c0_i32_0 = arith.constant 0 : i32
    return %arg0, %c0_i32 : i32, i32
  }
  func.func @transform_1(%arg0: i32) -> (i32, i32) {
    %c0_i32 = arith.constant 0 : i32
    %c0_i32_0 = arith.constant 0 : i32
    %c0_i32_1 = arith.constant 0 : i32
    return %c0_i32, %c0_i32_0 : i32, i32
  }
  func.func @transform_2(%arg0: i32) -> (i32, i32) {
    %c0_i32 = arith.constant 0 : i32
    %c0_i32_0 = arith.constant 0 : i32
    %c0_i32_1 = arith.constant 0 : i32
    return %c0_i32, %c0_i32_0 : i32, i32
  }
  func.func @transform_3(%arg0: i32) -> (i32, i32) {
    %c0_i32 = arith.constant 0 : i32
    %c0_i32_0 = arith.constant 0 : i32
    %c0_i32_1 = arith.constant 0 : i32
    return %c0_i32, %c0_i32_0 : i32, i32
  }
  func.func @transform_4(%arg0: i32) -> (i32, i32) {
    %c0_i32 = arith.constant 0 : i32
    %c0_i32_0 = arith.constant 0 : i32
    %c0_i32_1 = arith.constant 0 : i32
    return %c0_i32, %c0_i32_0 : i32, i32
  }
  func.func @transform_5(%arg0: i32) -> (i32, i32) {
    %c0_i32 = arith.constant 0 : i32
    %c0_i32_0 = arith.constant 0 : i32
    %c0_i32_1 = arith.constant 0 : i32
    return %c0_i32, %c0_i32_0 : i32, i32
  }
  func.func @transform_6(%arg0: i32) -> (i32, i32) {
    %c0_i32 = arith.constant 0 : i32
    %c0_i32_0 = arith.constant 0 : i32
    %c0_i32_1 = arith.constant 0 : i32
    return %c0_i32, %c0_i32_0 : i32, i32
  }
  func.func @transform_7(%arg0: i32) -> (i32, i32) {
    %c0_i32 = arith.constant 0 : i32
    %c0_i32_0 = arith.constant 0 : i32
    return %arg0, %c0_i32 : i32, i32
  }
}

</mosaic_0001>

<bundles_post_ra>
// kernel: mlp_forward.1
= control target key start
LH: loop header
LB: loop body
LE: loop exit
PB: predicated region body
PF: predicated region fallthrough
CT: control target
= control target key end

     0   :  { %12 = vsyncpa [#allocation3], 0  ;;  %vm428_vm0 = vcmask 1045504   ;;  %vm424_vm1 = vcmask 359424   ;;  %vm571_vm2 = vcmask 1043456   ;;  %vm530_vm3 = vcmask 982016   ;;  %s1146_s0 = inlined_call_operand.vmem [shape: f32[2,684], index: 0, kind: input, shape index: {}]   ;;  %s1147_s1 = inlined_call_operand.vmem [shape: bf16[684,120], index: 1, kind: input, shape index: {}]   ;;  %s1148_s2 = inlined_call_operand.vmem [shape: f32[1,120], index: 2, kind: input, shape index: {}]   ;;  %s1149_s3 = inlined_call_operand.vmem [shape: f32[120,60], index: 3, kind: input, shape index: {}]   ;;  %s1150_s4 = inlined_call_operand.vmem [shape: f32[1,60], index: 4, kind: input, shape index: {}]   ;;  %s1151_s5 = inlined_call_operand.vmem [shape: f32[60,8], index: 5, kind: input, shape index: {}]   ;;  %s1152_s6 = inlined_call_operand.vmem [shape: f32[1,8], index: 6, kind: input, shape index: {}]   ;;  %s1153_s7 = inlined_call_operand.hbm [shape: f32[2,8], index: 7, kind: output, shape index: {}]  }
   0x1   :  { %v798_v0 = vld [vmem:[%s1147_s1 + $0x38] sm:$0xff]  ;;  %v797_v2 = vld [vmem:[%s1147_s1 + $0x30] sm:$0xff]  ;;  %v796_v8 = vld [vmem:[%s1147_s1 + $0x28] sm:$0xff]  ;;  %vm567_vm4 = vcmask 490496   ;;  %vm595_vm5 = vcmask 64512  }
   0x2   :  { %v806_v1 = vld [vmem:[%s1147_s1 + $0x78] sm:$0xff]  ;;  %432 = vmatpush.bf16.msra.mxu0 %v798_v0  ;;  %v805_v5 = vld [vmem:[%s1147_s1 + $0x70] sm:$0xff]  ;;  %v804_v9 = vld [vmem:[%s1147_s1 + $0x68] sm:$0xff] }
   0x3   :  { %v814_v3 = vld [vmem:[%s1147_s1 + $0xb8] sm:$0xff]  ;;  %445 = vmatpush.bf16.msra.mxu1 %v806_v1  ;;  %v813_v6 = vld [vmem:[%s1147_s1 + $0xb0] sm:$0xff]  ;;  %v812_v10 = vld [vmem:[%s1147_s1 + $0xa8] sm:$0xff] }
   0x4   :  { %v822_v4 = vld [vmem:[%s1147_s1 + $0xf8] sm:$0xff]  ;;  %458 = vmatpush.bf16.msra.mxu2 %v814_v3  ;;  %v821_v7 = vld [vmem:[%s1147_s1 + $0xf0] sm:$0xff]  ;;  %v820_v11 = vld [vmem:[%s1147_s1 + $0xe8] sm:$0xff] }
   0x5   :  { %471 = vmatpush.bf16.msra.mxu3 %v822_v4  ;;  %v795_v12 = vld [vmem:[%s1147_s1 + $0x20] sm:$0xff]  ;;  %v30_v15 = vld [vmem:[%s1146_s0 + $0xc] sm:$0xff]  ;;  %v32_v16 = vld [vmem:[%s1146_s0 + $0x18] sm:$0xff] }
   0x6   :  { %433 = vmatpush.bf16.msra.mxu0 %v797_v2  ;;  %v803_v13 = vld [vmem:[%s1147_s1 + $0x60] sm:$0xff]  ;;  %46 = vst [vmem:[#allocation1 + $0x1] ss:$4 sm:$0xff] %v30_v15  ;;  %v794_v20 = vld [vmem:[%s1147_s1 + $0x18] sm:$0xff]  ;;  %v29_v23 = vld [vmem:[%s1146_s0 + $0x8] sm:$0xf] }
   0x7   :  { %446 = vmatpush.bf16.msra.mxu1 %v805_v5  ;;  %v28_v14 = vld [vmem:[%s1146_s0] sm:$0xff]  ;;  %48 = vst [vmem:[#allocation1 + $0x2] ss:$4 sm:$0xff] %v32_v16  ;;  %v802_v21 = vld [vmem:[%s1147_s1 + $0x58] sm:$0xff]  ;;  %v793_v24 = vld [vmem:[%s1147_s1 + $0x10] sm:$0xff] }
   0x8   :  { %459 = vmatpush.bf16.msra.mxu2 %v813_v6  ;;  %v34_v17 = vld [vmem:[%s1146_s0 + $0x24] sm:$0xff]  ;;  %44 = vst [vmem:[#allocation1] ss:$4 sm:$0xff] %v28_v14  ;;  %v810_v22 = vld [vmem:[%s1147_s1 + $0x98] sm:$0xff]  ;;  %v31_v26 = vld [vmem:[%s1146_s0 + $0x14] sm:$0xf] }
   0x9   :  { %472 = vmatpush.bf16.msra.mxu3 %v821_v7  ;;  %v811_v18 = vld [vmem:[%s1147_s1 + $0xa0] sm:$0xff]  ;;  %50 = vst [vmem:[#allocation1 + $0x3] ss:$4 sm:$0xff] %v34_v17  ;;  %v818_v25 = vld [vmem:[%s1147_s1 + $0xd8] sm:$0xff]  ;;  %v35_v28 = vld [vmem:[%s1146_s0 + $0x2c] sm:$0xf] }
   0xa   :  { %434 = vmatpush.bf16.msra.mxu0 %v796_v8  ;;  %v819_v19 = vld [vmem:[%s1147_s1 + $0xe0] sm:$0xff]  ;;  %52 = vst [vmem:[#allocation1 + $0x20] ss:$4 sm:$0xff] %v29_v23  ;;  %v801_v29 = vld [vmem:[%s1147_s1 + $0x50] sm:$0xff]  ;;  %v792_v32 = vld [vmem:[%s1147_s1 + $0x8] sm:$0xff] }
   0xb   :  { %447 = vmatpush.bf16.msra.mxu1 %v804_v9  ;;  %v33_v27 = vld [vmem:[%s1146_s0 + $0x20] sm:$0xf]  ;;  %54 = vst [vmem:[#allocation1 + $0x21] ss:$4 sm:$0xff] %v31_v26  ;;  %v809_v30 = vld [vmem:[%s1147_s1 + $0x90] sm:$0xff]  ;;  %v800_v33 = vld [vmem:[%s1147_s1 + $0x48] sm:$0xff] }
   0xc   :  { %460 = vmatpush.bf16.msra.mxu2 %v812_v10  ;;  %56 = vst [vmem:[#allocation1 + $0x22] ss:$4 sm:$0xff] %v33_v27  ;;  %v817_v31 = vld [vmem:[%s1147_s1 + $0xd0] sm:$0xff]  ;;  %v808_v36 = vld [vmem:[%s1147_s1 + $0x88] sm:$0xff]  ;;  %v791_v38 = vld [vmem:[%s1147_s1] sm:$0xff] }
   0xd   :  { %473 = vmatpush.bf16.msra.mxu3 %v820_v11  ;;  %58 = vst [vmem:[#allocation1 + $0x23] ss:$4 sm:$0xff] %v35_v28  ;;  %v785_v34 = vld [vmem:[%s1147_s1 + $0x150] sm:$0xf]  ;;  %v833_v35 = vld [vmem:[%s1147_s1 + $0x150] sm:$0x30] }
   0xe   :  { %435 = vmatpush.bf16.msra.mxu0 %v795_v12  ;;  %v816_v37 = vld [vmem:[%s1147_s1 + $0xc8] sm:$0xff]  ;;  %v786_v40 = vor.u32 %v833_v35, %v785_v34  ;;  %v830_v41 = vld [vmem:[%s1147_s1 + $0x138] sm:$0xff]  ;;  %v799_v42 = vld [vmem:[%s1147_s1 + $0x40] sm:$0xff] }
   0xf   :  { %448 = vmatpush.bf16.msra.mxu1 %v803_v13  ;;  %v807_v44 = vld [vmem:[%s1147_s1 + $0x80] sm:$0xff]  ;;  %v829_v51 = vld [vmem:[%s1147_s1 + $0x130] sm:$0xff]  ;;  %v832_v54 = vld [vmem:[%s1147_s1 + $0x148] sm:$0xff] }
  0x10   :  { %461 = vmatpush.bf16.msra.mxu2 %v811_v18  ;;  %v59_v39 = vld.sshfl [vmem:[#allocation1] sm:$0xff pattern:$0x73625140]  ;;  %v60_v43 = vld.sshfl [vmem:[#allocation1 + $0x8] sm:$0xff pattern:$0x73625140] }
  0x11   :  { %474 = vmatpush.bf16.msra.mxu3 %v819_v19  ;;  %v815_v45 = vld [vmem:[%s1147_s1 + $0xc0] sm:$0xff]  ;;  %v61_v46 = vld.sshfl [vmem:[#allocation1 + $0x10] sm:$0xff pattern:$0x73625140]  ;;  %v71_v47 = vpack.c.bf16 %v59_v39, %v59_v39  ;;  %v72_v49 = vpack.c.bf16 %v60_v43, %v60_v43  ;;  %v430_v50 = vsel %vm428_vm0, %v786_v40, 0  ;;  %v828_v55 = vld [vmem:[%s1147_s1 + $0x128] sm:$0xff] }
  0x12   :  { %436 = vmatpush.bf16.msra.mxu0 %v794_v20  ;;  %v62_v48 = vld.sshfl [vmem:[#allocation1 + $0x18] sm:$0xff pattern:$0x73625140]  ;;  %v73_v52 = vpack.c.bf16 %v61_v46, %v61_v46  ;;  %v831_v56 = vld [vmem:[%s1147_s1 + $0x140] sm:$0xff]  ;;  %v825_v61 = vld [vmem:[%s1147_s1 + $0x110] sm:$0xff] }
  0x13   :  { %449 = vmatpush.bf16.msra.mxu1 %v802_v21  ;;  %v74_v53 = vpack.c.bf16 %v62_v48, %v62_v48  ;;  %v827_v57 = vld [vmem:[%s1147_s1 + $0x120] sm:$0xff]  ;;  %v826_v58 = vld [vmem:[%s1147_s1 + $0x118] sm:$0xff]  ;;  %v824_v62 = vld [vmem:[%s1147_s1 + $0x108] sm:$0xff] }
  0x14   :  { %462 = vmatpush.bf16.msra.mxu2 %v810_v22  ;;  %v64_v59 = vld.sshfl [vmem:[#allocation1 + $0x28] sm:$0xff pattern:$0x73625140]  ;;  %v823_v63 = vld [vmem:[%s1147_s1 + $0x100] sm:$0xff]  ;;  %v525_v2 = vld [vmem:[%s1149_s3 + $0x70] sm:$0xff] }
  0x15   :  { %475 = vmatpush.bf16.msra.mxu3 %v818_v25  ;;  %v76_v60 = vpack.c.bf16 %v64_v59, %v64_v59  ;;  %v63_v0 = vld.sshfl [vmem:[#allocation1 + $0x20] sm:$0xff pattern:$0x73625140]  ;;  %v524_v3 = vld [vmem:[%s1149_s3 + $0x68] sm:$0xff]  ;;  %v522_v5 = vld [vmem:[%s1149_s3 + $0x58] sm:$0xff] }
  0x16   :  { %437 = vmatpush.bf16.msra.mxu0 %v793_v24  ;;  %v75_v1 = vpack.c.bf16 %v63_v0, %v63_v0  ;;  %v523_v4 = vld [vmem:[%s1149_s3 + $0x60] sm:$0xff]  ;;  %v521_v6 = vld [vmem:[%s1149_s3 + $0x50] sm:$0xff]  ;;  %v520_v7 = vld [vmem:[%s1149_s3 + $0x48] sm:$0xff] }
  0x17   :  { %450 = vmatpush.bf16.msra.mxu1 %v801_v29  ;;  %v519_v8 = vld [vmem:[%s1149_s3 + $0x40] sm:$0xff]  ;;  %v518_v9 = vld [vmem:[%s1149_s3 + $0x38] sm:$0xff]  ;;  %v517_v10 = vld [vmem:[%s1149_s3 + $0x30] sm:$0xff] }
  0x18   :  { %463 = vmatpush.bf16.msra.mxu2 %v809_v30  ;;  %v516_v11 = vld [vmem:[%s1149_s3 + $0x28] sm:$0xff]  ;;  %v515_v12 = vld [vmem:[%s1149_s3 + $0x20] sm:$0xff]  ;;  %v514_v13 = vld [vmem:[%s1149_s3 + $0x18] sm:$0xff] }
  0x19   :  { %476 = vmatpush.bf16.msra.mxu3 %v817_v31  ;;  %v513_v14 = vld [vmem:[%s1149_s3 + $0x10] sm:$0xff]  ;;  %v512_v16 = vld [vmem:[%s1149_s3 + $0x8] sm:$0xff]  ;;  %v511_v18 = vld [vmem:[%s1149_s3] sm:$0xff] }
  0x1a   :  { %438 = vmatpush.bf16.msra.mxu0 %v792_v32  ;;  %v562_v19 = vld [vmem:[%s1151_s5 + $0x38] sm:$0xf]  ;;  %v561_v20 = vld [vmem:[%s1151_s5 + $0x30] sm:$0xff]  ;;  %v560_v21 = vld [vmem:[%s1151_s5 + $0x28] sm:$0xff] }
  0x1b   :  { %451 = vmatpush.bf16.msra.mxu1 %v800_v33  ;;  %v559_v26 = vld [vmem:[%s1151_s5 + $0x20] sm:$0xff]  ;;  %v558_v27 = vld [vmem:[%s1151_s5 + $0x18] sm:$0xff]  ;;  %v557_v29 = vld [vmem:[%s1151_s5 + $0x10] sm:$0xff] }
  0x1c   :  { %464 = vmatpush.bf16.msra.mxu2 %v808_v36  ;;  %v837_v28 = vld [vmem:[%s1148_s2] ss:$0 sm:$0xff]  ;;  %v556_v43 = vld [vmem:[%s1151_s5 + $0x8] sm:$0xff] }
  0x1d   :  { %477 = vmatpush.bf16.msra.mxu3 %v816_v37 }
  0x1e   :  { %439 = vmatpush.bf16.msra.mxu0 %v791_v38 }
  0x1f   :  { %452 = vmatpush.bf16.msra.mxu1 %v799_v42 }
  0x20   :  { %465 = vmatpush.bf16.msra.mxu2 %v807_v44  ;;  %v555_v44 = vld [vmem:[%s1151_s5] sm:$0xff] }
  0x21   :  { %478 = vmatpush.bf16.msra.mxu3 %v815_v45  ;;  %440 = vmatmul.bf16.vlgmr.msra.gmra.mxu0 %v71_v47  ;;  %v838_v45 = vld [vmem:[%s1150_s4] ss:$0 sm:$0xff] }
  0x22   :  { %484 = vmatpush.bf16.msrb.mxu0 %v830_v41  ;;  %453 = vmatmul.bf16.vlgmr.msra.gmra.mxu1 %v72_v49  ;;  %v839_v49 = vld [vmem:[%s1152_s6] ss:$0 sm:$0xff] }
  0x23   :  { %502 = vmatpush.bf16.msrb.mxu1 %v430_v50  ;;  %466 = vmatmul.bf16.vlgmr.msra.gmra.mxu2 %v73_v52 }
  0x24   :  { %479 = vmatmul.bf16.vlgmr.msra.gmra.mxu3 %v74_v53  ;;  %535 = vmatpush.msrb.mxu2 %v525_v2 }
  0x25   :  { %789 = vmatpush.msk.msrb.mxu3 %vm571_vm2, %v562_v19 }
  0x26   :  { %485 = vmatpush.bf16.msrb.mxu0 %v829_v51  ;;  %536 = vmatpush.msrb.mxu2 %v524_v3 }
  0x27   :  { %503 = vmatpush.bf16.msrb.mxu1 %v832_v54  ;;  %584 = vmatpush.msrb.mxu3 %v561_v20 }
  0x28   :  { %537 = vmatpush.msrb.mxu2 %v523_v4 }
  0x29   :  { %585 = vmatpush.msrb.mxu3 %v560_v21 }
  0x2a   :  { %486 = vmatpush.bf16.msrb.mxu0 %v828_v55  ;;  %538 = vmatpush.msrb.mxu2 %v522_v5 }
  0x2b   :  { %504 = vmatpush.bf16.msrb.mxu1 %v831_v56  ;;  %586 = vmatpush.msrb.mxu3 %v559_v26 }
  0x2c   :  { %539 = vmatpush.msrb.mxu2 %v521_v6 }
  0x2d   :  { %587 = vmatpush.msrb.mxu3 %v558_v27 }
  0x2e   :  { %487 = vmatpush.bf16.msrb.mxu0 %v827_v57  ;;  %540 = vmatpush.msrb.mxu2 %v520_v7 }
  0x2f   :  { %588 = vmatpush.msrb.mxu3 %v557_v29 }
  0x30   :  { %541 = vmatpush.msrb.mxu2 %v519_v8 }
  0x31   :  { %589 = vmatpush.msrb.mxu3 %v556_v43 }
  0x32   :  { %488 = vmatpush.bf16.msrb.mxu0 %v826_v58  ;;  %787 = vmatmul.msk.bf16.vlgmr.msrb.gmra.mxu1 %vm424_vm1, %v76_v60 }
  0x33   :  { %542 = vmatpush.msrb.mxu2 %v518_v9  ;;  %590 = vmatpush.msrb.mxu3 %v555_v44 }
  0x35   :  { %543 = vmatpush.msrb.mxu2 %v517_v10 }
  0x36   :  { %489 = vmatpush.bf16.msrb.mxu0 %v825_v61 }
  0x37   :  { %544 = vmatpush.msrb.mxu2 %v516_v11 }
  0x39   :  { %545 = vmatpush.msrb.mxu2 %v515_v12 }
  0x3a   :  { %490 = vmatpush.bf16.msrb.mxu0 %v824_v62 }
  0x3b   :  { %546 = vmatpush.msrb.mxu2 %v514_v13 }
  0x3d   :  { %547 = vmatpush.msrb.mxu2 %v513_v14 }
  0x3e   :  { %491 = vmatpush.bf16.msrb.mxu0 %v823_v63 }
  0x3f   :  { %548 = vmatpush.msrb.mxu2 %v512_v16 }
  0x41   :  { %492 = vmatmul.bf16.vlgmr.msrb.gmra.mxu0 %v75_v1  ;;  %549 = vmatpush.msrb.mxu2 %v511_v18 }
  0x9e   :  { %v441_v15 = vpop.f32.mrf.mxu0 }
  0x9f   :  { %v454_v17 = vpop.f32.mrf.mxu1  ;;  %v442_v30 = vadd.f32 %v837_v28, %v441_v15 }
  0xa1   :  { %v455_v34 = vadd.f32 %v454_v17, %v442_v30 }
  0xa6   :  { %v443_v22 = vpop.f32.mrf.mxu0  ;;  %v467_v23 = vpop.f32.mrf.mxu2 }
  0xa7   :  { %v456_v24 = vpop.f32.mrf.mxu1  ;;  %v480_v25 = vpop.f32.mrf.mxu3  ;;  %v468_v35 = vadd.f32 %v467_v23, %v455_v34 }
  0xa9   :  { %v481_v37 = vadd.f32 %v480_v25, %v468_v35 }
  0xae   :  { %v469_v31 = vpop.f32.mrf.mxu2 }
  0xaf   :  { %v506_v32 = vpop.f32.mrf.mxu1  ;;  %v482_v33 = vpop.f32.mrf.mxu3 }
  0xb7   :  { %v508_v36 = vpop.f32.mrf.mxu1 }
  0xbe   :  { %v493_v38 = vpop.f32.mrf.mxu0 }
  0xbf   :  { %v494_v39 = vadd.f32 %v493_v38, %v481_v37 }
  0xc1   :  { %v507_v40 = vadd.f32 %v506_v32, %v494_v39 }
  0xc3   :  { %v510_v41 = vmax.f32 %v507_v40, 0.0 }
  0xc5   :  { %788 = vmatmul.msk.f32.vlgmr.msrb.gmra.mxu2 %vm530_vm3, %v510_v41 }
  0xc6   :  { %v495_v42 = vpop.f32.mrf.mxu0 }
 0x148   :  { %v551_v46 = vpop.f32.mrf.mxu2 }
 0x149   :  { %v552_v47 = vadd.f32 %v838_v45, %v551_v46 }
 0x14b   :  { %v554_v48 = vmax.f32 %v552_v47, 0.0 }
 0x14d   :  { %790 = vmatmul.msk.f32.vlgmr.msrb.gmra.mxu3 %vm567_vm4, %v554_v48 }
 0x1d0   :  { %v592_v50 = vpop.f32.mrf.mxu3 }
 0x1d1   :  { %v593_v51 = vadd.f32 %v839_v49, %v592_v50 }
 0x1d3   :  { %596 = vst.msk [vmem:[#allocation2] sm:$0xff] %vm595_vm5, %v593_v51 }
 0x1d4   :  { %600 = vsyncadd [#allocation3], 96  ;;  %s603_s12 = sshll.u32 %s1153_s7, 4  ;;  %s866_s13 = smov [#allocation2]   ;;  %s604_s12 = int_to_ptr.hbm [resolvable:$true] %s603_s12 }
 0x1d5   :  { %s601_s4 = sshll.u32 %s866_s13, 4  ;;  %s867_s14 = smov 32   ;;  %s602_s4 = int_to_ptr.vmem [resolvable:$true] %s601_s4 }
 0x1d6   :  { %s868_s15 = smov 2  }
 0x1d7   :  { %609 = dma.vmem_to_hbm [thread:$0]  %s602_s4, 32, %s604_s12, [#allocation3], %s867_s14, %s867_s14, %s868_s15  }
 0x1d8   :  { %864 = dma.done.wait [#allocation3], 128  }
 0x1d9   :  { %865 = vsyncadd [#allocation3], 4294967168 }
 0x1da   :  { %614 = vsyncpa [#allocation3], 1 }

</bundles_post_ra>
